<compile_context>
chip_gen: v5e
topology: v5e:2x2
jax: 0.10.0
libtpu: 0.0.40
codegen_flags: <defaults>
</compile_context>

<pallas_src>
import jax
import jax.numpy as jnp
from jax.experimental import pallas as pl
from jax.experimental.pallas import tpu as pltpu


# ---------------------------------------------------------------------------
# Kernels
# ---------------------------------------------------------------------------
def _linear_logits_kernel(x_ref, wt_ref, b_ref, logits_ref):
    # x_ref:      [tB, num_inputs]            (VMEM)
    # wt_ref:     [num_inputs, num_outputs]   (VMEM, W^T, pre-transposed at init)
    # b_ref:      [1, num_outputs]            (VMEM)
    # logits_ref: [tB, num_outputs]
    logits = jnp.dot(x_ref[...], wt_ref[...],
                     preferred_element_type=jnp.float32) + b_ref[...]
    logits_ref[...] = logits.astype(logits_ref.dtype)


def _linear_logits_probs_kernel(x_ref, wt_ref, b_ref, logits_ref, probs_ref):
    logits = jnp.dot(x_ref[...], wt_ref[...],
                     preferred_element_type=jnp.float32) + b_ref[...]
    logits_ref[...] = logits.astype(logits_ref.dtype)
    # sigmoid -> EUP slot (otherwise idle here); fused probs is essentially free
    # in-kernel and saves an extra HBM pass over the logits.
    probs_ref[...] = jax.nn.sigmoid(logits).astype(probs_ref.dtype)


# ---------------------------------------------------------------------------
# Hardware-derived sizing helpers
# ---------------------------------------------------------------------------
def _vmem_budget_bytes():
    """Half of the queried per-core VMEM (conservative fallback = v7x 64 MiB)."""
    cap = None
    try:
        cap = getattr(pltpu.get_tpu_info(), "vmem_capacity_bytes", None)
    except Exception:
        cap = None
    if not cap:
        cap = 64 * 1024 * 1024        # smallest per-TC VMEM across v5e/v6e/v7x
    return int(cap) // 2              # headroom for compiler scratch / buffers


def _batch_dimension_semantics(grid_len):
    """CORE_PARALLEL on v7x (2 TCs) when there are >= 2 grid steps."""
    try:
        kind = jax.devices()[0].device_kind.lower()
    except Exception:
        kind = ""
    core_parallel = getattr(pltpu, "CORE_PARALLEL", "parallel")
    if "v7" in kind and grid_len >= 2:
        return (core_parallel,)
    return ("parallel",)


# ---------------------------------------------------------------------------
# Wrapper
# ---------------------------------------------------------------------------
def bernoulli_head(x, weight_t, bias2d, *, tile_b=8192, with_probs=False,
                   small_b_cutoff=1024):
    """Bernoulli(logits=Linear(x)) head via Pallas.

    Args:
      x:        [B, num_inputs] float32 (or bfloat16 for mem-bound callers).
      weight_t: [num_inputs, num_outputs] (W^T, pre-transposed at init).
      bias2d:   [1, num_outputs] float32.
      tile_b:   batch rows per grid step (large to amortize per-step overhead).
      with_probs: also emit probs = sigmoid(logits) fused in-kernel.
    Returns:
      logits [B, num_outputs] f32, or (logits, probs) if with_probs.
    """
    B, num_inputs = x.shape
    num_outputs = weight_t.shape[1]

    logits_shape = jax.ShapeDtypeStruct((B, num_outputs), jnp.float32)
    if with_probs:
        kernel = _linear_logits_probs_kernel
        out_shape = (logits_shape,
                     jax.ShapeDtypeStruct((B, num_outputs), jnp.float32))
    else:
        kernel = _linear_logits_kernel
        out_shape = logits_shape
    n_out = 2 if with_probs else 1

    cost = pl.CostEstimate(
        flops=2 * B * num_inputs * num_outputs + (B * num_outputs if with_probs else 0),
        transcendentals=B * num_outputs if with_probs else 0,
        bytes_accessed=4 * (B * num_inputs + num_inputs * num_outputs + num_outputs
                            + n_out * B * num_outputs))

    vmem_budget = _vmem_budget_bytes()
    weight_bytes = 4 * (num_inputs * num_outputs + num_outputs)

    # --- tiny-B fast path: whole arrays VMEM-resident, no pipeline machinery.
    # Cutoff is bounded by the queried VMEM so it can never blow up on v7x.
    # (For production callers at these sizes a plain `x @ weight_t + bias2d`
    # fused by XLA is even cheaper than any custom call; the Pallas path is
    # kept so this module's forward runs through the kernel.)
    per_row_bytes = 4 * (num_inputs + n_out * num_outputs)
    resident_rows = max(0, (vmem_budget - weight_bytes)) // per_row_bytes
    if B <= min(small_b_cutoff, resident_rows):
        vspec = lambda: pl.BlockSpec(memory_space=pltpu.MemorySpace.VMEM)
        out_specs = (vspec(), vspec()) if with_probs else vspec()
        fn = pl.pallas_call(
            kernel,
            out_shape=out_shape,
            in_specs=[vspec(), vspec(), vspec()],
            out_specs=out_specs,
            compiler_params=pltpu.CompilerParams(vmem_limit_bytes=vmem_budget),
            cost_estimate=cost,
        )
        return fn(x, weight_t, bias2d)

    # --- large-B path: batch-only tiling (weight/bias resident), cdiv grid so
    # ANY B is handled; Pallas masks the partial last block's stores.
    dbl_row_bytes = 2 * per_row_bytes        # double-buffered x + output tiles
    max_tile_rows = max(8, ((vmem_budget - weight_bytes) // dbl_row_bytes) // 8 * 8)
    tile_eff = min(tile_b, max_tile_rows)
    if B < tile_eff:
        tile_eff = B                         # single full-extent block
    grid_len = pl.cdiv(B, tile_eff)

    out_spec = lambda: pl.BlockSpec((tile_eff, num_outputs), lambda i: (i, 0))
    out_specs = (out_spec(), out_spec()) if with_probs else out_spec()

    fn = pl.pallas_call(
        kernel,
        out_shape=out_shape,
        grid=(grid_len,),
        in_specs=[
            pl.BlockSpec((tile_eff, num_inputs), lambda i: (i, 0)),
            pl.BlockSpec((num_inputs, num_outputs), lambda i: (0, 0)),
            pl.BlockSpec((1, num_outputs), lambda i: (0, 0)),
        ],
        out_specs=out_specs,
        compiler_params=pltpu.CompilerParams(
            dimension_semantics=_batch_dimension_semantics(grid_len),
            vmem_limit_bytes=vmem_budget),
        cost_estimate=cost,
    )
    return fn(x, weight_t, bias2d)


def bernoulli_probs(logits):
    """Lazy derived parameter (consumer-side) when probs was not fused."""
    return jax.nn.sigmoid(logits)


# ---------------------------------------------------------------------------
# Parameter init (matches torch: orthogonal_ weight, zero bias)
# ---------------------------------------------------------------------------
def orthogonal_init(key, out_features, in_features, gain=1.0):
    """Deterministic equivalent of torch.nn.init.orthogonal_ for a 2D weight."""
    rows, cols = out_features, in_features
    flat = jax.random.normal(key, (max(rows, cols), min(rows, cols)), jnp.float32)
    q, r = jnp.linalg.qr(flat)
    d = jnp.sign(jnp.diagonal(r))
    d = jnp.where(d == 0, 1.0, d)
    q = q * d[None, :]
    if rows < cols:
        q = q.T
    return gain * q[:rows, :cols]


def init_bernoulli_params(key, num_inputs, num_outputs):
    """Module init: orthogonal W, zero b; store W^T and 2-D bias ONCE."""
    w = orthogonal_init(key, num_outputs, num_inputs)   # [out, in] (torch layout)
    weight_t = jnp.asarray(w.T)                         # [in, out], pre-transposed
    bias2d = jnp.zeros((1, num_outputs), jnp.float32)
    return weight_t, bias2d


# TODO(synk): torch.distributions.Bernoulli sampling / log_prob / entropy are
# consumer-side ops on the returned distribution, not part of this forward pass.

if __name__ == "__main__":
    key = jax.random.PRNGKey(0)
    k_w, k_x, k_xl = jax.random.split(key, 3)

    num_inputs, num_outputs, batch = 32, 16, 8
    weight_t, bias2d = init_bernoulli_params(k_w, num_inputs, num_outputs)

    # --- tiny-B path (grid-less, VMEM-resident), logits-only and fused probs ---
    x = jax.random.normal(k_x, (batch, num_inputs), jnp.float32)
    logits = bernoulli_head(x, weight_t, bias2d)
    logits_f, probs_f = bernoulli_head(x, weight_t, bias2d, with_probs=True)
    jax.block_until_ready((logits, logits_f, probs_f))

    ref = jnp.dot(x, weight_t, precision=jax.lax.Precision.HIGHEST) + bias2d
    assert jnp.allclose(logits, ref, atol=1e-4, rtol=1e-4), "logits mismatch (small B)"
    assert jnp.allclose(logits_f, ref, atol=1e-4, rtol=1e-4), "fused logits mismatch"
    assert jnp.allclose(probs_f, jax.nn.sigmoid(ref), atol=1e-4, rtol=1e-4), "probs mismatch"

    # --- tiled path: non-multiple batch exercises the masked partial last block ---
    big_batch = 2500                      # 3 grid steps at tile_b=1024, last partial
    x_big = jax.random.normal(k_xl, (big_batch, num_inputs), jnp.float32)
    logits_big = bernoulli_head(x_big, weight_t, bias2d, tile_b=1024, small_b_cutoff=0)
    jax.block_until_ready(logits_big)

    ref_big = jnp.dot(x_big, weight_t, precision=jax.lax.Precision.HIGHEST) + bias2d
    assert jnp.allclose(logits_big, ref_big, atol=1e-4, rtol=1e-4), "logits mismatch (tiled)"

    print("KERNEL_OK")
</pallas_src>

<mosaic_0001>
module attributes {stable_mosaic.version = 11 : i64} {
  func.func @_linear_logits_kernel(%arg0: memref<8x32xf32, #tpu.memory_space<vmem>>, %arg1: memref<32x16xf32, #tpu.memory_space<vmem>>, %arg2: memref<1x16xf32, #tpu.memory_space<vmem>>, %arg3: memref<8x16xf32, #tpu.memory_space<vmem>>) attributes {dimension_semantics = [], scalar_prefetch = 0 : i64, scratch_operands = 0 : i64, tpu.core_type = #tpu.core_type<tc>} {
    %c0 = arith.constant 0 : index
    %c0_0 = arith.constant 0 : index
    %0 = vector.load %arg0[%c0, %c0_0] : memref<8x32xf32, #tpu.memory_space<vmem>>, vector<8x32xf32>
    %c0_1 = arith.constant 0 : index
    %c0_2 = arith.constant 0 : index
    %1 = vector.load %arg1[%c0_1, %c0_2] : memref<32x16xf32, #tpu.memory_space<vmem>>, vector<32x16xf32>
    %cst = arith.constant dense<0.000000e+00> : vector<8x16xf32>
    %2 = tpu.matmul %0, %1, %cst {dimension_numbers = #tpu.dot_dimension_numbers<[1], [0], [0], [1], [0, 0, 1, 1], [], []>} : vector<8x32xf32>, vector<32x16xf32>, vector<8x16xf32> -> vector<8x16xf32>
    %c0_3 = arith.constant 0 : index
    %c0_4 = arith.constant 0 : index
    %3 = vector.load %arg2[%c0_3, %c0_4] : memref<1x16xf32, #tpu.memory_space<vmem>>, vector<1x16xf32>
    %4 = vector.broadcast %3 : vector<1x16xf32> to vector<8x16xf32>
    %5 = arith.addf %2, %4 : vector<8x16xf32>
    %c0_5 = arith.constant 0 : index
    %c0_6 = arith.constant 0 : index
    %6 = vector.load %arg3[%c0_5, %c0_6] : memref<8x16xf32, #tpu.memory_space<vmem>>, vector<8x16xf32>
    tpu.vector_store %arg3[%c0_5, %c0_6], %5 {strides = array<i32>} : memref<8x16xf32, #tpu.memory_space<vmem>>, vector<8x16xf32>,
    return
  }
}

</mosaic_0001>

<bundles_post_ra>
// kernel: tpu_custom_call.1
= control target key start
LH: loop header
LB: loop body
LE: loop exit
PB: predicated region body
PF: predicated region fallthrough
CT: control target
= control target key end

     0   :  { %s137_s0 = inlined_call_operand.vmem [shape: f32[8,32], index: 0, kind: input, shape index: {}]   ;;  %s138_s1 = inlined_call_operand.vmem [shape: f32[32,16], index: 1, kind: input, shape index: {}]   ;;  %s139_s2 = inlined_call_operand.vmem [shape: f32[1,16], index: 2, kind: input, shape index: {}]   ;;  %s140_s3 = inlined_call_operand.hbm [shape: f32[8,16], index: 3, kind: output, shape index: {}]  }
   0x1   :  { %v19_v0 = vld [vmem:[%s138_s1 + $0x18] sm:$0xff]  ;;  %v18_v1 = vld [vmem:[%s138_s1 + $0x10] sm:$0xff]  ;;  %v17_v2 = vld [vmem:[%s138_s1 + $0x8] sm:$0xff] }
   0x2   :  { %40 = vmatpush.msra.mxu0 %v19_v0 }
   0x3   :  { %8 = vsyncpa [#allocation3], 0  ;;  %v16_v3 = vld [vmem:[%s138_s1] sm:$0xff]  ;;  %vm24_vm0 = vcmask 261120   ;;  %s95_s24 = smov [#allocation2]   ;;  %s57_s28 = sshll.u32 %s140_s3, 4  ;;  %s58_s28 = int_to_ptr.hbm [resolvable:$true] %s57_s28 }
   0x4   :  { %41 = vmatpush.msra.mxu0 %v18_v1  ;;  %v15_v4 = vld [vmem:[%s137_s0] sm:$0xff]  ;;  %s55_s25 = sshll.u32 %s95_s24, 4  ;;  %vm48_vm1 = vcmask 130048   ;;  %s56_s25 = int_to_ptr.vmem [resolvable:$true] %s55_s25 }
   0x5   :  { %v68_v5 = vld [vmem:[%s139_s2] ss:$0 sm:$0xff] }
   0x6   :  { %42 = vmatpush.msra.mxu0 %v17_v2 }
   0x8   :  { %43 = vmatpush.msra.mxu0 %v16_v3 }
   0x9   :  { %66 = vmatmul.msk.f32.vlgmr.msra.gmra.mxu0 %vm24_vm0, %v15_v4 }
  0x86   :  { %v45_v6 = vpop.f32.mrf.mxu0 }
  0x87   :  { %v46_v7 = vadd.f32 %v68_v5, %v45_v6 }
  0x89   :  { %49 = vst.msk [vmem:[#allocation2] sm:$0xff] %vm48_vm1, %v46_v7 }
  0x8a   :  { %60 = dma.vmem_to_hbm [thread:$0]  %s56_s25, 128, %s58_s28, [#allocation3]  }
  0x8b   :  { %93 = dma.done.wait [#allocation3], 128  }
  0x8c   :  { %94 = vsyncadd [#allocation3], 4294967168 }
  0x8d   :  { %65 = vsyncpa [#allocation3], 1 }

</bundles_post_ra>
